<compile_context>
chip_gen: v6e
topology: v6e:2x2x1
jax: 0.10.0
libtpu: 0.0.40
codegen_flags: <defaults>
</compile_context>

<pallas_src>
import math
from functools import partial

import jax
import jax.numpy as jnp
from jax.experimental import pallas as pl
from jax.experimental.pallas import tpu as pltpu

HIDDEN = 128
NUM_HIDDEN_LAYERS = 2   # `layer_num` in the PyTorch module
TB_MAX = 2048           # max batch rows per grid step


def _round_up(x, m):
    return (x + m - 1) // m * m


def _cdiv(a, b):
    return -(-a // b)


def _tile_config(batch):
    """Choose (tile_rows, padded_batch) for the batch grid.

    - at most TB_MAX rows per tile,
    - >= 2 grid steps whenever batch > 128 (so v7x uses both TensorCores),
    - tile rounded to a multiple of 8 sublanes, so padding is only a few rows.
    """
    n_tiles = max(1, _cdiv(batch, TB_MAX))
    if batch > 128 and n_tiles < 2:
        n_tiles = 2
    tb = _round_up(_cdiv(batch, n_tiles), 8)
    padded = _round_up(batch, tb)
    return tb, padded


def _mlp_kernel(x_ref, w0_ref, wh_ref, w3_ref, b_ref, o_ref):
    """Fused MLP forward for one batch tile.

    x_ref : (TB, K)        f32   K = prod(state_shape), tiny (e.g. 4)
    w0_ref: (K, 128)       f32
    wh_ref: (L, 128, 128)  bf16  stacked hidden-layer weights
    w3_ref: (128, 128)     bf16  output weight, zero-padded to 128 lanes
    b_ref : (4, 128)       f32   rows = [b0, b1, b2, b3 (zero-padded)]
    o_ref : (TB, 128)      f32   lane-dense output (cols >= action_dim are 0+bias-pad)
    """
    x = x_ref[...]
    b = b_ref[...]                      # hoisted once; slices below are static

    # --- Layer 0: Linear(K, 128) + ReLU, on the otherwise-idle MXU ------
    # f32 operands / f32 accumulation; bias + ReLU in f32 (v5e-safe).
    h = jnp.dot(x, w0_ref[...], preferred_element_type=jnp.float32)
    h = jnp.maximum(h + b[0:1, :], 0.0)

    # --- Hidden layers: bf16 MXU operands, f32 accumulation/bias/ReLU ---
    for l in range(NUM_HIDDEN_LAYERS):
        h = jnp.dot(h.astype(jnp.bfloat16), wh_ref[l],
                    preferred_element_type=jnp.float32)
        h = jnp.maximum(h + b[l + 1:l + 2, :], 0.0)

    # --- Output layer: Linear(128, 128-padded), no activation -----------
    out = jnp.dot(h.astype(jnp.bfloat16), w3_ref[...],
                  preferred_element_type=jnp.float32)
    o_ref[...] = (out + b[3:4, :]).astype(o_ref.dtype)


def pack_params(params):
    """PyTorch-layout params -> kernel layout (fewer, larger DMAs, bf16 weights).

    params: (w0, b0, w1, b1, w2, b2, w3, b3) with weights stored (in, out).
    Returns (w0_f32[K,128], wh_bf16[L,128,128], w3_bf16[128,128], b_f32[4,128]).
    """
    w0, b0, w1, b1, w2, b2, w3, b3 = params
    action_dim = w3.shape[1]
    # Hard-coded kernel config; fail loudly on anything wider.
    assert w0.shape[1] == HIDDEN and w1.shape == (HIDDEN, HIDDEN) \
        and w2.shape == (HIDDEN, HIDDEN) and w3.shape[0] == HIDDEN, \
        "kernel hard-codes HIDDEN=128, layer_num=2"
    assert action_dim <= HIDDEN, "kernel packs the output layer into 128 lanes"

    wh = jnp.stack([w1, w2]).astype(jnp.bfloat16)
    # Zero-pad the output weight to 128 lanes -> lane-dense output stores.
    w3p = jnp.zeros((HIDDEN, HIDDEN), jnp.bfloat16)
    w3p = w3p.at[:, :action_dim].set(jnp.asarray(w3, jnp.bfloat16))

    b = jnp.zeros((4, HIDDEN), jnp.float32)
    b = b.at[0, :].set(jnp.reshape(b0, (-1,)))
    b = b.at[1, :].set(jnp.reshape(b1, (-1,)))
    b = b.at[2, :].set(jnp.reshape(b2, (-1,)))
    b = b.at[3, :action_dim].set(jnp.reshape(b3, (-1,)))
    return (jnp.asarray(w0, jnp.float32), wh, w3p, b)


@partial(jax.jit, static_argnames=("action_dim",))
def net_forward(s, packed_params, *, action_dim):
    """Equivalent of Net.forward: returns logits of shape (batch, action_dim)."""
    batch = s.shape[0]
    x = s.reshape(batch, -1).astype(jnp.float32)     # s.view(batch, -1)
    state_dim = x.shape[1]
    w0, wh, w3p, b = packed_params

    # Batch tiling: weights stay VMEM-resident, x/out stream through.
    tb, padded = _tile_config(batch)
    if padded != batch:
        x = jnp.pad(x, ((0, padded - batch), (0, 0)))
    grid = (padded // tb,)

    flops = 2 * padded * (state_dim * HIDDEN
                          + NUM_HIDDEN_LAYERS * HIDDEN * HIDDEN
                          + HIDDEN * HIDDEN)
    bytes_accessed = (x.size * 4 + w0.size * 4 + wh.size * 2
                      + w3p.size * 2 + b.size * 4 + padded * HIDDEN * 4)

    out = pl.pallas_call(
        _mlp_kernel,
        out_shape=jax.ShapeDtypeStruct((padded, HIDDEN), jnp.float32),
        grid=grid,
        in_specs=[
            pl.BlockSpec((tb, state_dim), lambda i: (i, 0)),                         # x tile
            pl.BlockSpec((state_dim, HIDDEN), lambda i: (0, 0)),                     # w0 resident
            pl.BlockSpec((NUM_HIDDEN_LAYERS, HIDDEN, HIDDEN), lambda i: (0, 0, 0)),  # w1/w2 resident
            pl.BlockSpec((HIDDEN, HIDDEN), lambda i: (0, 0)),                        # w3 resident (padded)
            pl.BlockSpec((4, HIDDEN), lambda i: (0, 0)),                             # biases resident
        ],
        out_specs=pl.BlockSpec((tb, HIDDEN), lambda i: (i, 0)),                      # lane-dense output
        compiler_params=pltpu.CompilerParams(
            dimension_semantics=("parallel",)),
        cost_estimate=pl.CostEstimate(
            flops=flops, transcendentals=0, bytes_accessed=bytes_accessed),
    )(x, w0, wh, w3p, b)

    # Slice away batch padding and the lane padding of the output layer.
    return out[:batch, :action_dim]


def init_params(key, state_dim, layer_num, action_dim):
    """PyTorch-default-style uniform init; weights stored as (in, out)."""
    assert layer_num == NUM_HIDDEN_LAYERS, "kernel hard-codes layer_num=2"
    dims = ([(state_dim, HIDDEN)]
            + [(HIDDEN, HIDDEN)] * layer_num
            + [(HIDDEN, action_dim)])
    params = []
    for fan_in, fan_out in dims:
        key, kw, kb = jax.random.split(key, 3)
        bound = 1.0 / math.sqrt(fan_in)
        w = jax.random.uniform(kw, (fan_in, fan_out), jnp.float32, -bound, bound)
        bias = jax.random.uniform(kb, (1, fan_out), jnp.float32, -bound, bound)
        params += [w, bias]
    return tuple(params)


def reference_forward(s, params):
    """Pure-JAX reference mirroring the module with the same bf16 weight path."""
    batch = s.shape[0]
    x = s.reshape(batch, -1).astype(jnp.float32)
    w0, b0, w1, b1, w2, b2, w3, b3 = params
    h = jnp.maximum(jnp.dot(x, w0, preferred_element_type=jnp.float32) + b0, 0.0)
    for w, bvec in ((w1, b1), (w2, b2)):
        h = jnp.dot(h.astype(jnp.bfloat16), w.astype(jnp.bfloat16),
                    preferred_element_type=jnp.float32) + bvec
        h = jnp.maximum(h, 0.0)
    return jnp.dot(h.astype(jnp.bfloat16), w3.astype(jnp.bfloat16),
                   preferred_element_type=jnp.float32) + b3


if __name__ == "__main__":
    # CartPole-v0: observation_space.shape == (4,), action_space.n == 2
    # TODO(synk): gym env construction / torch-tensor coercion is host-side glue,
    # not kernel work; shapes are reproduced here directly.
    state_shape = (4,)
    action_dim = 2
    layer_num = 2

    key = jax.random.PRNGKey(0)
    key, k_params, k_in1, k_in2, k_in3 = jax.random.split(key, 5)
    state_dim = int(math.prod(state_shape))

    params = init_params(k_params, state_dim, layer_num, action_dim)
    packed = pack_params(params)

    # Case 1: batch that fits a single tile exactly.
    s1 = jax.random.normal(k_in1, (8,) + state_shape, jnp.float32)
    logits1 = jax.block_until_ready(net_forward(s1, packed, action_dim=action_dim))
    ref1 = reference_forward(s1, params)
    assert logits1.shape == (8, action_dim)
    assert jnp.allclose(logits1, ref1, atol=5e-3, rtol=5e-3), "mismatch (batch=8)"

    # Case 2: ragged batch (pad-to-tile / slice-back path).
    s2 = jax.random.normal(k_in2, (5,) + state_shape, jnp.float32)
    logits2 = jax.block_until_ready(net_forward(s2, packed, action_dim=action_dim))
    ref2 = reference_forward(s2, params)
    assert logits2.shape == (5, action_dim)
    assert jnp.allclose(logits2, ref2, atol=5e-3, rtol=5e-3), "mismatch (batch=5)"

    # Case 3: batch > 128 -> two grid steps (dual-TensorCore path on v7x) with
    # small ragged padding.
    s3 = jax.random.normal(k_in3, (200,) + state_shape, jnp.float32)
    logits3 = jax.block_until_ready(net_forward(s3, packed, action_dim=action_dim))
    ref3 = reference_forward(s3, params)
    assert logits3.shape == (200, action_dim)
    assert jnp.allclose(logits3, ref3, atol=5e-3, rtol=5e-3), "mismatch (batch=200)"

    # forward() returns (logits, state); state passes through unchanged (None).
    _result = (logits1, None)

    print("KERNEL_OK")
</pallas_src>

<mosaic_0001>
module attributes {stable_mosaic.version = 11 : i64} {
  func.func @_mlp_kernel(%arg0: i32, %arg1: memref<8x4xf32, #tpu.memory_space<vmem>>, %arg2: memref<4x128xf32, #tpu.memory_space<vmem>>, %arg3: memref<2x128x128xbf16, #tpu.memory_space<vmem>>, %arg4: memref<128x128xbf16, #tpu.memory_space<vmem>>, %arg5: memref<4x128xf32, #tpu.memory_space<vmem>>, %arg6: memref<8x128xf32, #tpu.memory_space<vmem>>) attributes {dimension_semantics = [#tpu.dimension_semantics<parallel>], iteration_bounds = array<i64: 1>, scalar_prefetch = 0 : i64, scratch_operands = 0 : i64, tpu.core_type = #tpu.core_type<tc>, window_params = [{transform_indices = @transform_0, window_bounds = array<i64: 8, 4>}, {pipeline_mode = #tpu.pipeline_mode<synchronous>, transform_indices = @transform_1, window_bounds = array<i64: 4, 128>}, {pipeline_mode = #tpu.pipeline_mode<synchronous>, transform_indices = @transform_2, window_bounds = array<i64: 2, 128, 128>}, {pipeline_mode = #tpu.pipeline_mode<synchronous>, transform_indices = @transform_3, window_bounds = array<i64: 128, 128>}, {pipeline_mode = #tpu.pipeline_mode<synchronous>, transform_indices = @transform_4, window_bounds = array<i64: 4, 128>}, {transform_indices = @transform_5, window_bounds = array<i64: 8, 128>}]} {
    %c0 = arith.constant 0 : index
    %c0_0 = arith.constant 0 : index
    %0 = vector.load %arg1[%c0, %c0_0] : memref<8x4xf32, #tpu.memory_space<vmem>>, vector<8x4xf32>
    %c0_1 = arith.constant 0 : index
    %c0_2 = arith.constant 0 : index
    %1 = vector.load %arg5[%c0_1, %c0_2] : memref<4x128xf32, #tpu.memory_space<vmem>>, vector<4x128xf32>
    %c0_3 = arith.constant 0 : index
    %c0_4 = arith.constant 0 : index
    %2 = vector.load %arg2[%c0_3, %c0_4] : memref<4x128xf32, #tpu.memory_space<vmem>>, vector<4x128xf32>
    %cst = arith.constant dense<0.000000e+00> : vector<8x128xf32>
    %3 = tpu.matmul %0, %2, %cst {dimension_numbers = #tpu.dot_dimension_numbers<[1], [0], [0], [1], [0, 0, 1, 1], [], []>} : vector<8x4xf32>, vector<4x128xf32>, vector<8x128xf32> -> vector<8x128xf32>
    %4 = vector.extract_strided_slice %1 {offsets = [0, 0], sizes = [1, 128], strides = [1, 1]} : vector<4x128xf32> to vector<1x128xf32>
    %5 = vector.broadcast %4 : vector<1x128xf32> to vector<8x128xf32>
    %6 = arith.addf %3, %5 : vector<8x128xf32>
    %cst_5 = arith.constant 0.000000e+00 : f32
    %7 = vector.broadcast %cst_5 : f32 to vector<8x128xf32>
    %8 = arith.maximumf %6, %7 : vector<8x128xf32>
    %9 = arith.truncf %8 : vector<8x128xf32> to vector<8x128xbf16>
    %c0_6 = arith.constant 0 : index
    %c0_7 = arith.constant 0 : index
    %c0_8 = arith.constant 0 : index
    %10 = vector.load %arg3[%c0_6, %c0_7, %c0_8] : memref<2x128x128xbf16, #tpu.memory_space<vmem>>, vector<1x128x128xbf16>
    %11 = vector.shape_cast %10 : vector<1x128x128xbf16> to vector<128x128xbf16>
    %cst_9 = arith.constant dense<0.000000e+00> : vector<8x128xf32>
    %12 = tpu.matmul %9, %11, %cst_9 {dimension_numbers = #tpu.dot_dimension_numbers<[1], [0], [0], [1], [0, 0, 1, 1], [], []>} : vector<8x128xbf16>, vector<128x128xbf16>, vector<8x128xf32> -> vector<8x128xf32>
    %13 = vector.extract_strided_slice %1 {offsets = [1, 0], sizes = [1, 128], strides = [1, 1]} : vector<4x128xf32> to vector<1x128xf32>
    %14 = vector.broadcast %13 : vector<1x128xf32> to vector<8x128xf32>
    %15 = arith.addf %12, %14 : vector<8x128xf32>
    %cst_10 = arith.constant 0.000000e+00 : f32
    %16 = vector.broadcast %cst_10 : f32 to vector<8x128xf32>
    %17 = arith.maximumf %15, %16 : vector<8x128xf32>
    %18 = arith.truncf %17 : vector<8x128xf32> to vector<8x128xbf16>
    %c1 = arith.constant 1 : index
    %c0_11 = arith.constant 0 : index
    %c0_12 = arith.constant 0 : index
    %19 = vector.load %arg3[%c1, %c0_11, %c0_12] : memref<2x128x128xbf16, #tpu.memory_space<vmem>>, vector<1x128x128xbf16>
    %20 = vector.shape_cast %19 : vector<1x128x128xbf16> to vector<128x128xbf16>
    %cst_13 = arith.constant dense<0.000000e+00> : vector<8x128xf32>
    %21 = tpu.matmul %18, %20, %cst_13 {dimension_numbers = #tpu.dot_dimension_numbers<[1], [0], [0], [1], [0, 0, 1, 1], [], []>} : vector<8x128xbf16>, vector<128x128xbf16>, vector<8x128xf32> -> vector<8x128xf32>
    %22 = vector.extract_strided_slice %1 {offsets = [2, 0], sizes = [1, 128], strides = [1, 1]} : vector<4x128xf32> to vector<1x128xf32>
    %23 = vector.broadcast %22 : vector<1x128xf32> to vector<8x128xf32>
    %24 = arith.addf %21, %23 : vector<8x128xf32>
    %cst_14 = arith.constant 0.000000e+00 : f32
    %25 = vector.broadcast %cst_14 : f32 to vector<8x128xf32>
    %26 = arith.maximumf %24, %25 : vector<8x128xf32>
    %27 = arith.truncf %26 : vector<8x128xf32> to vector<8x128xbf16>
    %c0_15 = arith.constant 0 : index
    %c0_16 = arith.constant 0 : index
    %28 = vector.load %arg4[%c0_15, %c0_16] : memref<128x128xbf16, #tpu.memory_space<vmem>>, vector<128x128xbf16>
    %cst_17 = arith.constant dense<0.000000e+00> : vector<8x128xf32>
    %29 = tpu.matmul %27, %28, %cst_17 {dimension_numbers = #tpu.dot_dimension_numbers<[1], [0], [0], [1], [0, 0, 1, 1], [], []>} : vector<8x128xbf16>, vector<128x128xbf16>, vector<8x128xf32> -> vector<8x128xf32>
    %30 = vector.extract_strided_slice %1 {offsets = [3, 0], sizes = [1, 128], strides = [1, 1]} : vector<4x128xf32> to vector<1x128xf32>
    %31 = vector.broadcast %30 : vector<1x128xf32> to vector<8x128xf32>
    %32 = arith.addf %29, %31 : vector<8x128xf32>
    %c0_18 = arith.constant 0 : index
    %c0_19 = arith.constant 0 : index
    %33 = vector.load %arg6[%c0_18, %c0_19] : memref<8x128xf32, #tpu.memory_space<vmem>>, vector<8x128xf32>
    tpu.vector_store %arg6[%c0_18, %c0_19], %32 {strides = array<i32>} : memref<8x128xf32, #tpu.memory_space<vmem>>, vector<8x128xf32>,
    return
  }
  func.func @transform_0(%arg0: i32) -> (i32, i32) {
    %c0_i32 = arith.constant 0 : i32
    %c0_i32_0 = arith.constant 0 : i32
    return %arg0, %c0_i32 : i32, i32
  }
  func.func @transform_1(%arg0: i32) -> (i32, i32) {
    %c0_i32 = arith.constant 0 : i32
    %c0_i32_0 = arith.constant 0 : i32
    %c0_i32_1 = arith.constant 0 : i32
    return %c0_i32, %c0_i32_0 : i32, i32
  }
  func.func @transform_2(%arg0: i32) -> (i32, i32, i32) {
    %c0_i32 = arith.constant 0 : i32
    %c0_i32_0 = arith.constant 0 : i32
    %c0_i32_1 = arith.constant 0 : i32
    %c0_i32_2 = arith.constant 0 : i32
    return %c0_i32, %c0_i32_0, %c0_i32_1 : i32, i32, i32
  }
  func.func @transform_3(%arg0: i32) -> (i32, i32) {
    %c0_i32 = arith.constant 0 : i32
    %c0_i32_0 = arith.constant 0 : i32
    %c0_i32_1 = arith.constant 0 : i32
    return %c0_i32, %c0_i32_0 : i32, i32
  }
  func.func @transform_4(%arg0: i32) -> (i32, i32) {
    %c0_i32 = arith.constant 0 : i32
    %c0_i32_0 = arith.constant 0 : i32
    %c0_i32_1 = arith.constant 0 : i32
    return %c0_i32, %c0_i32_0 : i32, i32
  }
  func.func @transform_5(%arg0: i32) -> (i32, i32) {
    %c0_i32 = arith.constant 0 : i32
    %c0_i32_0 = arith.constant 0 : i32
    return %arg0, %c0_i32 : i32, i32
  }
}

</mosaic_0001>

<bundles_post_ra>
// kernel: net_forward.1
= control target key start
LH: loop header
LB: loop body
LE: loop exit
PB: predicated region body
PF: predicated region fallthrough
CT: control target
= control target key end

     0   :  { %10 = vsyncpa [#allocation3], 0  ;;  %s753_s0 = inlined_call_operand.vmem [shape: f32[8,4], index: 0, kind: input, shape index: {}]   ;;  %s754_s1 = inlined_call_operand.vmem [shape: f32[4,128], index: 1, kind: input, shape index: {}]   ;;  %s755_s2 = inlined_call_operand.hbm [shape: bf16[2,128,128], index: 2, kind: input, shape index: {}]   ;;  %s756_s3 = inlined_call_operand.hbm [shape: bf16[128,128], index: 3, kind: input, shape index: {}]   ;;  %s757_s4 = inlined_call_operand.vmem [shape: f32[4,128], index: 4, kind: input, shape index: {}]   ;;  %s758_s5 = inlined_call_operand.vmem [shape: f32[8,128], index: 5, kind: output, shape index: {}]  }
   0x1   :  { %11 = vsyncpa [#allocation5], 0  ;;  %s666_s18 = smov [#allocation2]  }
   0x2   :  { %s21_s19 = sshll.u32 %s666_s18, 4  ;;  %s22_s19 = int_to_ptr.vmem [resolvable:$true] %s21_s19 }
   0x3   :  { %s630_s20 = scalar_lea.vmem %s22_s19, 2048  ;;  %p635_p1 = scmp.lt.s32.totalorder %s22_s19, %s22_s19 }
   0x4   :  { %p631_p0 = scmp.ne.s32.totalorder %s22_s19, %s630_s20  ;;  %p636_p2 = scmp.lt.s32.totalorder %s630_s20, %s630_s20 }
   0x6   :  { %p637_p3 = por %p636_p2, %p635_p1 }
   0x8   :  { %p638_p4 = pnand %p637_p3, %p631_p0 }
   0xa   :  { %641 = shalt.err (!%p638_p4)
}
   0xb   :  { %s667_s21 = smov 64   ;;  %s668_s22 = smov 4  }
   0xc   :  { %27 = dma.hbm_to_vmem [thread:$0]  %s755_s2, 2048, %s22_s19, [#allocation3], %s667_s21, %s667_s21, %s668_s22  }
   0xd   :  { %s669_s25 = smov [#allocation4]  }
   0xe   :  { %s33_s26 = sshll.u32 %s669_s25, 4  ;;  %s34_s26 = int_to_ptr.vmem [resolvable:$true] %s33_s26 }
   0xf   :  { %s650_s27 = scalar_lea.vmem %s34_s26, 1024  ;;  %p655_p6 = scmp.lt.s32.totalorder %s34_s26, %s34_s26 }
  0x10   :  { %p651_p5 = scmp.ne.s32.totalorder %s34_s26, %s650_s27  ;;  %p656_p7 = scmp.lt.s32.totalorder %s650_s27, %s650_s27 }
  0x12   :  { %p657_p8 = por %p656_p7, %p655_p6 }
  0x14   :  { %p658_p9 = pnand %p657_p8, %p651_p5 }
  0x16   :  { %661 = shalt.err (!%p658_p9)
}
  0x17   :  { %39 = dma.hbm_to_vmem [thread:$0]  %s756_s3, 1024, %s34_s26, [#allocation5], %s667_s21, %s667_s21, %s668_s22  }
  0x18   :  { %662 = dma.done.wait [#allocation3], 2048  }
  0x19   :  { %663 = vsyncadd [#allocation3], 4294965248 }
  0x1a   :  { %664 = dma.done.wait [#allocation5], 1024  }
  0x1b   :  { %665 = vsyncadd [#allocation5], 4294966272  ;;  %v670_v0 = vmov 0.0   ;;  %vm671_vm0 = vmmov 0   ;;  %vm60_vm1 = vcmask 1043456   ;;  %vm56_vm2 = vcmask 31744  }
  0x1c   :  { %527 = vmatprep.subr.mxu0 %v670_v0  ;;  %529 = vmatprep.mubr.msk.f32.mxu0 %vm671_vm0, %v670_v0  ;;  %v51_v1 = vld [vmem:[%s754_s1] sm:$0xf]  ;;  %v598_v3 = vld [vmem:[#allocation2 + $0x38] sm:$0xff]   ;;  %v599_v4 = vld [vmem:[#allocation2 + $0x30] sm:$0xff]   ;;  %v52_v17 = vlaneseq }
  0x1d   :  { %532 = vmatprep.subr.bf16.mxu1 %v670_v0  ;;  %548 = vmatprep.mubr.msk.bf16.mxu1 %vm671_vm0, %v670_v0  ;;  %v49_v2 = vld [vmem:[%s753_s0] sm:$0xff]  ;;  %v600_v5 = vld [vmem:[#allocation2 + $0x28] sm:$0xff]   ;;  %v602_v7 = vld [vmem:[#allocation2 + $0x18] sm:$0xff]  }
  0x1e   :  { %528 = vmatpush3.msk.msra.mxu0 %vm60_vm1, %v51_v1  ;;  %533 = vmatpush3.bf16.msra.mxu1 %v598_v3  ;;  %v601_v6 = vld [vmem:[#allocation2 + $0x20] sm:$0xff]   ;;  %v603_v8 = vld [vmem:[#allocation2 + $0x10] sm:$0xff]   ;;  %v604_v9 = vld [vmem:[#allocation2 + $0x8] sm:$0xff]   ;;  %v53_v18 = vshrl.u32 %v52_v17, 7 }
  0x1f   :  { %530 = vmatmul.mubr.msk.f32.vlgmr.msra.gmra.mxu0 %vm56_vm2, %v49_v2  ;;  %552 = vmatprep.subr.bf16.mxu0 %v670_v0  ;;  %v605_v10 = vld [vmem:[#allocation2] sm:$0xff]   ;;  %v606_v11 = vld [vmem:[#allocation2 + $0x78] sm:$0xff]   ;;  %v607_v12 = vld [vmem:[#allocation2 + $0x70] sm:$0xff]  }
  0x20   :  { %568 = vmatprep.mubr.msk.bf16.mxu0 %vm671_vm0, %v670_v0  ;;  %534 = vmatprep.subr.bf16.mxu1 %v670_v0  ;;  %v608_v13 = vld [vmem:[#allocation2 + $0x68] sm:$0xff]   ;;  %v609_v14 = vld [vmem:[#allocation2 + $0x60] sm:$0xff]   ;;  %v610_v15 = vld [vmem:[#allocation2 + $0x58] sm:$0xff]   ;;  %v54_v19 = vsub.s32 0, %v53_v18  ;;  %v154_v35 = vsub.s32 1, %v53_v18  ;;  %v265_v46 = vsub.s32 2, %v53_v18 }
  0x21   :  { %553 = vmatpush3.bf16.msra.mxu0 %v606_v11  ;;  %v611_v16 = vld [vmem:[#allocation2 + $0x50] sm:$0xff]   ;;  %v50_v20 = vld [vmem:[%s757_s4] sm:$0xf]  ;;  %v612_v27 = vld [vmem:[#allocation2 + $0x48] sm:$0xff]   ;;  %v375_v55 = vsub.s32 3, %v53_v18 }
  0x22   :  { %535 = vmatpush3.bf16.msra.mxu1 %v599_v4  ;;  %554 = vmatprep.subr.bf16.mxu0 %v670_v0  ;;  %v55_v21 = vrot.slane %v50_v20, %v54_v19  ;;  %v613_v28 = vld [vmem:[#allocation2 + $0x40] sm:$0xff]   ;;  %v614_v29 = vld [vmem:[#allocation4 + $0x38] sm:$0xff]   ;;  %v615_v30 = vld [vmem:[#allocation4 + $0x30] sm:$0xff]   ;;  %v155_v36 = vrot.slane %v50_v20, %v154_v35  ;;  %v266_v47 = vrot.slane %v50_v20, %v265_v46 }
  0x23   :  { %536 = vmatprep.subr.bf16.mxu1 %v670_v0  ;;  %v616_v31 = vld [vmem:[#allocation4 + $0x28] sm:$0xff]   ;;  %v617_v32 = vld [vmem:[#allocation4 + $0x20] sm:$0xff]   ;;  %v618_v33 = vld [vmem:[#allocation4 + $0x18] sm:$0xff]   ;;  %v376_v56 = vrot.slane %v50_v20, %v375_v55 }
  0x24   :  { %v619_v34 = vld [vmem:[#allocation4 + $0x10] sm:$0xff]   ;;  %v620_v44 = vld [vmem:[#allocation4 + $0x8] sm:$0xff]   ;;  %v621_v45 = vld [vmem:[#allocation4] sm:$0xff]  }
  0x25   :  { %555 = vmatpush3.bf16.msra.mxu0 %v607_v12 }
  0x26   :  { %537 = vmatpush3.bf16.msra.mxu1 %v600_v5  ;;  %556 = vmatprep.subr.bf16.mxu0 %v670_v0 }
  0x27   :  { %538 = vmatprep.subr.bf16.mxu1 %v670_v0 }
  0x29   :  { %557 = vmatpush3.bf16.msra.mxu0 %v608_v13 }
  0x2a   :  { %539 = vmatpush3.bf16.msra.mxu1 %v601_v6  ;;  %558 = vmatprep.subr.bf16.mxu0 %v670_v0 }
  0x2b   :  { %540 = vmatprep.subr.bf16.mxu1 %v670_v0 }
  0x2d   :  { %559 = vmatpush3.bf16.msra.mxu0 %v609_v14 }
  0x2e   :  { %541 = vmatpush3.bf16.msra.mxu1 %v602_v7  ;;  %560 = vmatprep.subr.bf16.mxu0 %v670_v0 }
  0x2f   :  { %542 = vmatprep.subr.bf16.mxu1 %v670_v0 }
  0x31   :  { %561 = vmatpush3.bf16.msra.mxu0 %v610_v15 }
  0x32   :  { %543 = vmatpush3.bf16.msra.mxu1 %v603_v8  ;;  %562 = vmatprep.subr.bf16.mxu0 %v670_v0 }
  0x33   :  { %544 = vmatprep.subr.bf16.mxu1 %v670_v0 }
  0x35   :  { %563 = vmatpush3.bf16.msra.mxu0 %v611_v16 }
  0x36   :  { %545 = vmatpush3.bf16.msra.mxu1 %v604_v9  ;;  %564 = vmatprep.subr.bf16.mxu0 %v670_v0 }
  0x37   :  { %546 = vmatprep.subr.bf16.mxu1 %v670_v0 }
  0x39   :  { %565 = vmatpush3.bf16.msra.mxu0 %v612_v27 }
  0x3a   :  { %547 = vmatpush3.bf16.msra.mxu1 %v605_v10  ;;  %566 = vmatprep.subr.bf16.mxu0 %v670_v0 }
  0x3b   :  { %572 = vmatprep.subr.bf16.mxu1 %v670_v0 }
  0x3d   :  { %567 = vmatpush3.bf16.msra.mxu0 %v613_v28 }
  0xdf   :  { %v130_v22 = vpop.f32.mrf.mxu0 }
  0xe0   :  { %v131_v23 = vadd.f32 %v130_v22, %v55_v21 }
  0xe1   :  { %v531_v24 = vpop.f32.mrf.mxu0 }
  0xe2   :  { %v134_v25 = vmax.f32 %v131_v23, 0.0 }
  0xe4   :  { %v135_v26 = vpack.c.bf16 %v134_v25, %v134_v25 }
  0xe6   :  { %549 = vmatmul.mubr.bf16.vlgmr.msra.gmra.mxu1 %v135_v26 }
  0xe7   :  { %588 = vmatprep.mubr.msk.bf16.mxu1 %vm671_vm0, %v670_v0  ;;  %573 = vmatpush3.bf16.msra.mxu1 %v614_v29 }
  0xe8   :  { %574 = vmatprep.subr.bf16.mxu1 %v670_v0 }
  0xeb   :  { %575 = vmatpush3.bf16.msra.mxu1 %v615_v30 }
  0xec   :  { %576 = vmatprep.subr.bf16.mxu1 %v670_v0 }
  0xef   :  { %577 = vmatpush3.bf16.msra.mxu1 %v616_v31 }
  0xf0   :  { %578 = vmatprep.subr.bf16.mxu1 %v670_v0 }
  0xf3   :  { %579 = vmatpush3.bf16.msra.mxu1 %v617_v32 }
  0xf4   :  { %580 = vmatprep.subr.bf16.mxu1 %v670_v0 }
  0xf7   :  { %581 = vmatpush3.bf16.msra.mxu1 %v618_v33 }
  0xf8   :  { %582 = vmatprep.subr.bf16.mxu1 %v670_v0 }
  0xfb   :  { %583 = vmatpush3.bf16.msra.mxu1 %v619_v34 }
  0xfc   :  { %584 = vmatprep.subr.bf16.mxu1 %v670_v0 }
  0xff   :  { %585 = vmatpush3.bf16.msra.mxu1 %v620_v44 }
 0x100   :  { %586 = vmatprep.subr.bf16.mxu1 %v670_v0 }
 0x103   :  { %587 = vmatpush3.bf16.msra.mxu1 %v621_v45 }
 0x1a6   :  { %v238_v37 = vpop.f32.mrf.mxu1 }
 0x1a7   :  { %v239_v38 = vadd.f32 %v238_v37, %v155_v36 }
 0x1a8   :  { %v550_v39 = vpop.f32.mrf.mxu1 }
 0x1a9   :  { %v244_v40 = vmax.f32 %v239_v38, 0.0 }
 0x1aa   :  { %v241_v41 = vpop.f32.mrf.mxu1 }
 0x1ab   :  { %v245_v42 = vpack.c.bf16 %v244_v40, %v244_v40 }
 0x1ac   :  { %v551_v43 = vpop.f32.mrf.mxu1 }
 0x1ad   :  { %569 = vmatmul.mubr.bf16.vlgmr.msra.gmra.mxu0 %v245_v42 }
 0x26d   :  { %v349_v48 = vpop.f32.mrf.mxu0 }
 0x26e   :  { %v350_v49 = vadd.f32 %v349_v48, %v266_v47 }
 0x26f   :  { %v570_v50 = vpop.f32.mrf.mxu0 }
 0x270   :  { %v355_v51 = vmax.f32 %v350_v49, 0.0 }
 0x271   :  { %v352_v52 = vpop.f32.mrf.mxu0 }
 0x272   :  { %v356_v53 = vpack.c.bf16 %v355_v51, %v355_v51 }
 0x273   :  { %v571_v54 = vpop.f32.mrf.mxu0 }
 0x274   :  { %589 = vmatmul.mubr.bf16.vlgmr.msra.gmra.mxu1 %v356_v53 }
 0x334   :  { %v459_v57 = vpop.f32.mrf.mxu1 }
 0x335   :  { %v460_v58 = vadd.f32 %v459_v57, %v376_v56 }
 0x336   :  { %v590_v59 = vpop.f32.mrf.mxu1 }
 0x337   :  { %465 = vst [vmem:[%s758_s5] sm:$0xff] %v460_v58 }
 0x338   :  { %v462_v60 = vpop.f32.mrf.mxu1 }
 0x33a   :  { %v591_v61 = vpop.f32.mrf.mxu1 }
 0x33b   :  { %470 = vsyncpa [#allocation3], 1 }
 0x33c   :  { %471 = vsyncpa [#allocation5], 1 }

</bundles_post_ra>
